<compile_context>
chip_gen: v7x
topology: tpu7x:2x2x1
jax: 0.10.0
libtpu: 0.0.40
codegen_flags: <defaults>
</compile_context>

<pallas_src>
import functools
import math

import jax
import jax.numpy as jnp
from jax.experimental import pallas as pl
from jax.experimental.pallas import tpu as pltpu


def _round_up(x, m):
    return (x + m - 1) // m * m


def _mish(x):
    # numerically-safe softplus from exp/log/where (Mosaic friendly), f32
    sp = jnp.where(x > 20.0, x, jnp.log(1.0 + jnp.exp(jnp.minimum(x, 20.0))))
    return x * jnp.tanh(sp)


# ----------------------- matmul (+ bias, + fused Mish) -----------------------

def _mm_kernel(x_ref, w_ref, b_ref, o_ref, acc_ref, *, act):
    @pl.when(pl.program_id(2) == 0)
    def _():
        acc_ref[...] = jnp.zeros_like(acc_ref)

    acc_ref[...] += jnp.dot(x_ref[...], w_ref[...],
                            preferred_element_type=jnp.float32)

    @pl.when(pl.program_id(2) == pl.num_programs(2) - 1)
    def _():
        y = acc_ref[...] + b_ref[...]
        if act:
            y = _mish(y)
        o_ref[...] = y


def matmul_bias_act(x, w, b, act=False):
    """(M,K) @ (K,N) + b with optional fused Mish.  bf16 inputs, f32 accum."""
    M, K = x.shape
    _, N = w.shape
    tm = min(256, _round_up(M, 16))
    tn = min(256, _round_up(N, 128))
    tk = min(512, _round_up(K, 128))
    Mp, Kp, Np = _round_up(M, tm), _round_up(K, tk), _round_up(N, tn)
    xp = jnp.zeros((Mp, Kp), jnp.bfloat16).at[:M, :K].set(x.astype(jnp.bfloat16))
    wp = jnp.zeros((Kp, Np), jnp.bfloat16).at[:K, :N].set(w.astype(jnp.bfloat16))
    bp = jnp.zeros((1, Np), jnp.float32).at[:, :N].set(b.astype(jnp.float32))
    out = pl.pallas_call(
        functools.partial(_mm_kernel, act=act),
        out_shape=jax.ShapeDtypeStruct((Mp, Np), jnp.float32),
        grid=(Mp // tm, Np // tn, Kp // tk),
        in_specs=[
            pl.BlockSpec((tm, tk), lambda i, j, k: (i, k)),
            pl.BlockSpec((tk, tn), lambda i, j, k: (k, j)),
            pl.BlockSpec((1, tn), lambda i, j, k: (0, j)),
        ],
        out_specs=pl.BlockSpec((tm, tn), lambda i, j, k: (i, j)),
        scratch_shapes=[pltpu.VMEM((tm, tn), jnp.float32)],
        compiler_params=pltpu.CompilerParams(
            dimension_semantics=("parallel", "parallel", "arbitrary")),
    )(xp, wp, bp)
    return out[:M, :N]


def conv1x1(x, w, b, act=False):
    """Stride-1 1x1 conv (grouped convs use block-diagonal w).  x: NHWC."""
    N, H, W, C = x.shape
    y = matmul_bias_act(x.reshape(N * H * W, C), w, b, act=act)
    return y.reshape(N, H, W, w.shape[-1])


# -------------------- kxk conv via in-kernel tap accumulation ----------------

def _conv_tap_kernel(x_ref, w_ref, b_ref, o_ref, acc_ref, *, kw, H, W, act):
    di = pl.program_id(1)                     # which kernel row (tap row)

    @pl.when(di == 0)
    def _():
        acc_ref[...] = jnp.zeros_like(acc_ref)

    rows = x_ref[0, pl.ds(di, H), :, :]       # (H, W + kw - 1, Cin)
    cin = rows.shape[-1]
    acc = acc_ref[...]
    for dj in range(kw):                      # static unroll over kernel cols
        xs = rows[:, dj:dj + W, :].reshape(H * W, cin)
        acc = acc + jnp.dot(xs, w_ref[0, dj],
                            preferred_element_type=jnp.float32)
    acc_ref[...] = acc

    @pl.when(di == pl.num_programs(1) - 1)
    def _():
        y = acc_ref[...] + b_ref[...]
        if act:
            y = _mish(y)
        o_ref[0] = y


def conv_kxk(x, w, b, kh, kw, act=False):
    """Stride-1 Conv2dDynamicSamePadding, k>1.  x: NHWC.
    w: (kh*kw, Cin, Cout), block-diagonal over (Cin, Cout) for grouped convs."""
    N, H, W, Cin = x.shape
    Cout = w.shape[-1]
    ph, pw = kh - 1, kw - 1
    xp = jnp.pad(x.astype(jnp.bfloat16),
                 ((0, 0), (ph // 2, ph - ph // 2), (pw // 2, pw - pw // 2), (0, 0)))
    Coutp = _round_up(Cout, 128)              # lane-dense output slab
    wp = jnp.zeros((kh, kw, Cin, Coutp), jnp.bfloat16)
    wp = wp.at[..., :Cout].set(w.reshape(kh, kw, Cin, Cout).astype(jnp.bfloat16))
    bp = jnp.zeros((1, Coutp), jnp.float32).at[:, :Cout].set(b.astype(jnp.float32))
    Hp, Wp = H + ph, W + pw
    out = pl.pallas_call(
        functools.partial(_conv_tap_kernel, kw=kw, H=H, W=W, act=act),
        out_shape=jax.ShapeDtypeStruct((N, H * W, Coutp), jnp.float32),
        grid=(N, kh),
        in_specs=[
            pl.BlockSpec((1, Hp, Wp, Cin), lambda n, t: (n, 0, 0, 0)),
            pl.BlockSpec((1, kw, Cin, Coutp), lambda n, t: (t, 0, 0, 0)),
            pl.BlockSpec((1, Coutp), lambda n, t: (0, 0)),
        ],
        out_specs=pl.BlockSpec((1, H * W, Coutp), lambda n, t: (n, 0, 0)),
        scratch_shapes=[pltpu.VMEM((H * W, Coutp), jnp.float32)],
        compiler_params=pltpu.CompilerParams(
            dimension_semantics=("parallel", "arbitrary")),
    )(xp, wp, bp)
    return out[:, :, :Cout].reshape(N, H, W, Cout)


# --------------------------- GroupNorm + Mish kernel -------------------------

def _gn_mish_kernel(x_ref, g_ref, b_ref, o_ref, *, groups, eps):
    x = x_ref[0]                               # (HW, C) f32, one sample
    hw, c = x.shape
    cg = c // groups
    cnt = float(hw * cg)
    # channel->group one-hot (C, G) and its transpose, built from iota (tiny)
    oh = (jax.lax.broadcasted_iota(jnp.int32, (c, groups), 0) // cg ==
          jax.lax.broadcasted_iota(jnp.int32, (c, groups), 1)).astype(jnp.float32)
    oh_t = (jax.lax.broadcasted_iota(jnp.int32, (groups, c), 1) // cg ==
            jax.lax.broadcasted_iota(jnp.int32, (groups, c), 0)).astype(jnp.float32)
    s = jnp.sum(x, axis=0, keepdims=True)      # (1, C)
    q = jnp.sum(x * x, axis=0, keepdims=True)  # (1, C)
    gs = jnp.dot(s, oh, preferred_element_type=jnp.float32)   # (1, G)
    gq = jnp.dot(q, oh, preferred_element_type=jnp.float32)   # (1, G)
    mean_g = gs / cnt
    var_g = gq / cnt - mean_g * mean_g         # biased variance (as torch GN)
    inv_g = jax.lax.rsqrt(var_g + eps)
    mean_c = jnp.dot(mean_g, oh_t, preferred_element_type=jnp.float32)  # (1, C)
    inv_c = jnp.dot(inv_g, oh_t, preferred_element_type=jnp.float32)    # (1, C)
    y = (x - mean_c) * inv_c * g_ref[...] + b_ref[...]
    o_ref[0] = _mish(y)


def group_norm_mish(x, gamma, beta, groups, eps=1e-3):
    N, H, W, C = x.shape
    x3 = x.reshape(N, H * W, C)
    y = pl.pallas_call(
        functools.partial(_gn_mish_kernel, groups=groups, eps=eps),
        out_shape=jax.ShapeDtypeStruct(x3.shape, jnp.float32),
        grid=(N,),
        in_specs=[
            pl.BlockSpec((1, H * W, C), lambda n: (n, 0, 0)),
            pl.BlockSpec((1, C), lambda n: (0, 0)),
            pl.BlockSpec((1, C), lambda n: (0, 0)),
        ],
        out_specs=pl.BlockSpec((1, H * W, C), lambda n: (n, 0, 0)),
        compiler_params=pltpu.CompilerParams(dimension_semantics=("parallel",)),
    )(x3, gamma.reshape(1, C), beta.reshape(1, C))
    return y.reshape(N, H, W, C)


# ------------------- AddN + global-pool and split-attention ------------------

def _addn_pool_kernel(x_ref, o_ref, *, splits, inv_hw):
    x = x_ref[0]                               # (HW, splits*C)
    s = jnp.sum(x, axis=0, keepdims=True)      # spatial sum; /HW below = mean
    c = s.shape[-1] // splits
    acc = s[:, :c]
    for i in range(1, splits):                 # AddN over the radix splits
        acc = acc + s[:, i * c:(i + 1) * c]
    o_ref[0] = acc * inv_hw


def addn_pool(x3, splits):
    """x3: (N, HW, splits*C) -> (N, C) = adaptive_avg_pool(AddN(splits))."""
    # TODO(synk): tile HW for large spatial sizes; full-block per sample is
    # fine at these shapes (HW <= 64).
    N, HW, RC = x3.shape
    C = RC // splits
    out = pl.pallas_call(
        functools.partial(_addn_pool_kernel, splits=splits, inv_hw=1.0 / HW),
        out_shape=jax.ShapeDtypeStruct((N, 1, C), jnp.float32),
        grid=(N,),
        in_specs=[pl.BlockSpec((1, HW, RC), lambda n: (n, 0, 0))],
        out_specs=pl.BlockSpec((1, 1, C), lambda n: (n, 0, 0)),
        compiler_params=pltpu.CompilerParams(dimension_semantics=("parallel",)),
    )(x3)
    return out.reshape(N, C)


def _split_attn_kernel(l_ref, x_ref, o_ref, *, r):
    l = l_ref[0]                               # (1, r*C), group-major
    x = x_ref[0]                               # (HW, r*C)
    c = l.shape[-1] // r
    acc = jnp.zeros((x.shape[0], c), jnp.float32)
    for i in range(r):
        s = l[:, i * c:(i + 1) * c]
        m = jnp.max(s, axis=-1, keepdims=True)
        e = jnp.exp(s - m)
        # softmax over channels per split (matches torch.softmax(dim=1) on the
        # (N, C, 1, 1) chunk in the reference)
        p = e / jnp.sum(e, axis=-1, keepdims=True)
        acc = acc + p * x[:, i * c:(i + 1) * c]
    o_ref[0] = acc


def split_attn_combine(logits, x3, r):
    """logits: (N, r*C) group-major; x3: (N, HW, r*C) -> (N, HW, C)."""
    N, HW, RC = x3.shape
    C = RC // r
    out = pl.pallas_call(
        functools.partial(_split_attn_kernel, r=r),
        out_shape=jax.ShapeDtypeStruct((N, HW, C), jnp.float32),
        grid=(N,),
        in_specs=[
            pl.BlockSpec((1, 1, RC), lambda n: (n, 0, 0)),
            pl.BlockSpec((1, HW, RC), lambda n: (n, 0, 0)),
        ],
        out_specs=pl.BlockSpec((1, HW, C), lambda n: (n, 0, 0)),
        compiler_params=pltpu.CompilerParams(dimension_semantics=("parallel",)),
    )(logits.reshape(N, 1, RC), x3)
    return out


# ------------------------------ avg-pool glue --------------------------------

def avg_pool_same(x, k=3, s=2):
    # Pool2dStaticSamePadding('AVG') = ZeroPad2d(SAME) + nn.AvgPool2d(k, s);
    # AvgPool2d default count_include_pad=True -> divisor is always k*k.
    N, H, W, C = x.shape
    Ho, Wo = -(-H // s), -(-W // s)
    ph = max((Ho - 1) * s + k - H, 0)
    pw = max((Wo - 1) * s + k - W, 0)
    xp = jnp.pad(x, ((0, 0), (ph // 2, ph - ph // 2),
                     (pw // 2, pw - pw // 2), (0, 0)))
    summed = jax.lax.reduce_window(xp, 0.0, jax.lax.add,
                                   (1, k, k, 1), (1, s, s, 1), 'VALID')
    return summed / float(k * k)


# ------------------------------ parameter init -------------------------------

class KeyGen:
    def __init__(self, seed=0):
        self._key = jax.random.PRNGKey(seed)

    def __call__(self):
        self._key, k = jax.random.split(self._key)
        return k


def make_conv1x1_w(kg, cin, cout, groups=1):
    """1x1 conv weight as a dense (Cin, Cout) matrix.  Grouped convs become a
    block-diagonal matrix so the matmul kernel is a single lane-dense matmul;
    output channels remain group-major (matches torch.chunk order)."""
    std = math.sqrt(2.0 / (1 * 1 * cout))        # _initialize_weights
    cpg, opg = cin // groups, cout // groups
    blocks = std * jax.random.normal(kg(), (groups, cpg, opg), jnp.float32)
    w = jnp.zeros((cin, cout), jnp.float32)
    for g in range(groups):
        w = w.at[g * cpg:(g + 1) * cpg, g * opg:(g + 1) * opg].set(blocks[g])
    return w, jnp.zeros((cout,), jnp.float32)


def make_conv_kxk_w(kg, kh, kw, cin, cout, groups=1):
    """kxk conv weight as (kh*kw, Cin, Cout), block-diagonal per tap."""
    std = math.sqrt(2.0 / (kh * kw * cout))
    cpg, opg = cin // groups, cout // groups
    blocks = std * jax.random.normal(kg(), (kh * kw, groups, cpg, opg),
                                     jnp.float32)
    w = jnp.zeros((kh * kw, cin, cout), jnp.float32)
    for g in range(groups):
        w = w.at[:, g * cpg:(g + 1) * cpg, g * opg:(g + 1) * opg].set(blocks[:, g])
    return w, jnp.zeros((cout,), jnp.float32)


def make_bn(c, eps):
    # eval-mode BatchNorm with gamma=1, beta=0, running_mean=0, running_var=1
    scale = jnp.full((c,), 1.0 / math.sqrt(1.0 + eps), jnp.float32)
    shift = jnp.zeros((c,), jnp.float32)
    return scale, shift


def fold_bn(w, b, scale, shift):
    # scale/shift act on the output-channel (last) axis of w
    return w * scale, b * scale + shift


def init_split_attention(kg, r, cin, inner):
    d1_w, d1_b = make_conv1x1_w(kg, cin, inner, 1)
    d1_w, d1_b = fold_bn(d1_w, d1_b, *make_bn(inner, 1e-3))
    d2_w, d2_b = make_conv1x1_w(kg, inner, cin * r, r)
    return dict(r=r, d1_w=d1_w, d1_b=d1_b, d2_w=d2_w, d2_b=d2_b)


def init_cardinal(kg, r, cin):
    c1_w, c1_b = make_conv1x1_w(kg, cin, cin, r)
    gn1 = (jnp.ones((cin,), jnp.float32), jnp.zeros((cin,), jnp.float32))
    c3_w, c3_b = make_conv_kxk_w(kg, 3, 3, cin, cin * r, r)
    gn3 = (jnp.ones((cin * r,), jnp.float32), jnp.zeros((cin * r,), jnp.float32))
    sa = init_split_attention(kg, r, cin, cin * 2)
    return dict(r=r, c1_w=c1_w, c1_b=c1_b, gn1=gn1,
                c3_w=c3_w, c3_b=c3_b, gn3=gn3, sa=sa)   # gn3 included (bug fix)


def init_oneblock(kg, cin, cout, k=2, r=4):
    cards = [init_cardinal(kg, r, cin // k) for _ in range(k)]
    c1_w, c1_b = make_conv1x1_w(kg, cin, cin, 1)
    c1_w, c1_b = fold_bn(c1_w, c1_b, *make_bn(cin, 1e-3))
    p = dict(k=k, cards=cards, c1_w=c1_w, c1_b=c1_b, downsample=(cin != cout))
    if cin != cout:
        ds_w, ds_b = make_conv1x1_w(kg, cin, cout, 1)
        p['ds_w'], p['ds_b'] = fold_bn(ds_w, ds_b, *make_bn(cout, 1e-3))
    return p


def init_resnest(kg, in_channels, num_classes, w=1, d=1):
    stem_w, stem_b = make_conv_kxk_w(kg, 7, 7, in_channels, 64 * w, 1)
    stem_w, stem_b = fold_bn(stem_w, stem_b, *make_bn(64 * w, 1e-3))

    def bottleneck(cin, cout, layers):
        blocks = [init_oneblock(kg, cin, cout)]
        for _ in range(layers - 1):
            blocks.append(init_oneblock(kg, cout, cout))
        return blocks

    b1 = bottleneck(64 * w, 128 * w, 3 * d)
    b2 = bottleneck(128 * w, 256 * w, 4 * d)
    b3 = bottleneck(256 * w, 512 * w, 6 * d)
    b4 = bottleneck(512 * w, 1024 * w, 3 * d)
    head_w, head_b = make_conv1x1_w(kg, 1024 * w, 1280, 1)
    head_w, head_b = fold_bn(head_w, head_b, *make_bn(1280, 1e-5))
    fc_w = 0.01 * jax.random.normal(kg(), (1280, num_classes), jnp.float32)
    fc_b = jnp.zeros((num_classes,), jnp.float32)
    return dict(stem_w=stem_w, stem_b=stem_b, bottlenecks=[b1, b2, b3, b4],
                head_w=head_w, head_b=head_b, fc_w=fc_w, fc_b=fc_b)


# ---------------------------------- forward ----------------------------------

def split_attention_forward(p, h):
    """h: (N, H, W, r*C) conv3 output (group-major channels)."""
    r = p['r']
    N, H, W, RC = h.shape
    C = RC // r
    h3 = h.reshape(N, H * W, RC)
    pooled = addn_pool(h3, r)                                       # (N, C)
    d1 = matmul_bias_act(pooled, p['d1_w'], p['d1_b'], act=True)    # (N, inner)
    logits = matmul_bias_act(d1, p['d2_w'], p['d2_b'], act=False)   # (N, r*C)
    out = split_attn_combine(logits, h3, r)                         # (N, HW, C)
    return out.reshape(N, H, W, C)


def cardinal_forward(p, x):
    r = p['r']
    h = conv1x1(x, p['c1_w'], p['c1_b'])
    h = group_norm_mish(h, *p['gn1'], groups=r)
    h = conv_kxk(h, p['c3_w'], p['c3_b'], 3, 3)
    h = group_norm_mish(h, *p['gn3'], groups=r)
    return split_attention_forward(p['sa'], h)


def oneblock_forward(p, x):
    chunks = jnp.split(x, p['k'], axis=-1)
    outs = [cardinal_forward(cp, c) for cp, c in zip(p['cards'], chunks)]
    cat = conv1x1(jnp.concatenate(outs, axis=-1), p['c1_w'], p['c1_b'])
    if p['downsample']:
        added = cat + x
        pooled = avg_pool_same(added, 3, 2)
        return conv1x1(pooled, p['ds_w'], p['ds_b'])
    # eval mode: drop_connect_B is a training-only no-op
    return cat + x


def resnest_forward(params, x_nchw):
    x = jnp.transpose(x_nchw, (0, 2, 3, 1)).astype(jnp.float32)     # NCHW->NHWC
    x = conv_kxk(x, params['stem_w'], params['stem_b'], 7, 7, act=True)
    for bottleneck in params['bottlenecks']:
        for blk in bottleneck:
            x = oneblock_forward(blk, x)
    x = conv1x1(x, params['head_w'], params['head_b'], act=True)
    N, H, W, C = x.shape
    pooled = addn_pool(x.reshape(N, H * W, C), splits=1)            # (N, 1280)
    # eval mode: Dropout is identity
    logits = matmul_bias_act(pooled, params['fc_w'], params['fc_b'])
    return logits                                                   # (N, classes)


if __name__ == "__main__":
    IN_CHANNELS, NUM_CLASSES, W_MULT, D_MULT = 3, 10, 1, 1
    kg = KeyGen(42)
    params = init_resnest(kg, IN_CHANNELS, NUM_CLASSES, w=W_MULT, d=D_MULT)
    x = jax.random.normal(jax.random.PRNGKey(0), (2, IN_CHANNELS, 8, 8),
                          jnp.float32)
    out = resnest_forward(params, x)
    out = jax.block_until_ready(out)
    assert out.shape == (2, NUM_CLASSES)
    print("KERNEL_OK")
</pallas_src>

<mosaic_0001>
module attributes {stable_mosaic.version = 11 : i64} {
  func.func @_conv_tap_kernel(%arg0: i32, %arg1: i32, %arg2: memref<1x14x14x3xbf16, #tpu.memory_space<vmem>>, %arg3: memref<1x7x3x128xbf16, #tpu.memory_space<vmem>>, %arg4: memref<1x128xf32, #tpu.memory_space<vmem>>, %arg5: memref<1x64x128xf32, #tpu.memory_space<vmem>>, %arg6: memref<64x128xf32, #tpu.memory_space<vmem>>) attributes {dimension_semantics = [#tpu.dimension_semantics<parallel>, #tpu.dimension_semantics<arbitrary>], iteration_bounds = array<i64: 2, 7>, scalar_prefetch = 0 : i64, scratch_operands = 1 : i64, tpu.core_type = #tpu.core_type<tc>, window_params = [{transform_indices = @transform_0, window_bounds = array<i64: 1, 14, 14, 3>}, {transform_indices = @transform_1, window_bounds = array<i64: 1, 7, 3, 128>}, {pipeline_mode = #tpu.pipeline_mode<synchronous>, transform_indices = @transform_2, window_bounds = array<i64: 1, 128>}, {transform_indices = @transform_3, window_bounds = array<i64: 1, 64, 128>}]} {
    %c0_i32 = arith.constant 0 : i32
    %0 = arith.cmpi eq, %arg1, %c0_i32 : i32
    %1 = arith.extui %0 : i1 to i32
    %c0_i32_0 = arith.constant 0 : i32
    %2 = arith.cmpi ne, %1, %c0_i32_0 : i32
    scf.if %2 {
      %cst_36 = arith.constant 0.000000e+00 : f32
      %53 = vector.broadcast %cst_36 : f32 to vector<64x128xf32>
      %c0_37 = arith.constant 0 : index
      %c0_38 = arith.constant 0 : index
      %54 = vector.load %arg6[%c0_37, %c0_38] : memref<64x128xf32, #tpu.memory_space<vmem>>, vector<64x128xf32>
      tpu.vector_store %arg6[%c0_37, %c0_38], %53 {strides = array<i32>} : memref<64x128xf32, #tpu.memory_space<vmem>>, vector<64x128xf32>,
    } else {
    }
    %c0 = arith.constant 0 : index
    %3 = arith.index_cast %arg1 : i32 to index
    %c0_1 = arith.constant 0 : index
    %c0_2 = arith.constant 0 : index
    %4 = vector.load %arg2[%c0, %3, %c0_1, %c0_2] : memref<1x14x14x3xbf16, #tpu.memory_space<vmem>>, vector<1x8x14x3xbf16>
    %5 = vector.shape_cast %4 : vector<1x8x14x3xbf16> to vector<8x14x3xbf16>
    %c0_3 = arith.constant 0 : index
    %c0_4 = arith.constant 0 : index
    %6 = vector.load %arg6[%c0_3, %c0_4] : memref<64x128xf32, #tpu.memory_space<vmem>>, vector<64x128xf32>
    %7 = vector.extract_strided_slice %5 {offsets = [0, 0, 0], sizes = [8, 8, 3], strides = [1, 1, 1]} : vector<8x14x3xbf16> to vector<8x8x3xbf16>
    %8 = vector.shape_cast %7 : vector<8x8x3xbf16> to vector<64x3xbf16>
    %c0_5 = arith.constant 0 : index
    %c0_6 = arith.constant 0 : index
    %c0_7 = arith.constant 0 : index
    %c0_8 = arith.constant 0 : index
    %9 = vector.load %arg3[%c0_5, %c0_6, %c0_7, %c0_8] : memref<1x7x3x128xbf16, #tpu.memory_space<vmem>>, vector<1x1x3x128xbf16>
    %10 = vector.shape_cast %9 : vector<1x1x3x128xbf16> to vector<3x128xbf16>
    %cst = arith.constant dense<0.000000e+00> : vector<64x128xf32>
    %11 = tpu.matmul %8, %10, %cst {dimension_numbers = #tpu.dot_dimension_numbers<[1], [0], [0], [1], [0, 0, 1, 1], [], []>} : vector<64x3xbf16>, vector<3x128xbf16>, vector<64x128xf32> -> vector<64x128xf32>
    %12 = arith.addf %6, %11 : vector<64x128xf32>
    %13 = vector.extract_strided_slice %5 {offsets = [0, 1, 0], sizes = [8, 8, 3], strides = [1, 1, 1]} : vector<8x14x3xbf16> to vector<8x8x3xbf16>
    %14 = vector.shape_cast %13 : vector<8x8x3xbf16> to vector<64x3xbf16>
    %c0_9 = arith.constant 0 : index
    %c1 = arith.constant 1 : index
    %c0_10 = arith.constant 0 : index
    %c0_11 = arith.constant 0 : index
    %15 = vector.load %arg3[%c0_9, %c1, %c0_10, %c0_11] : memref<1x7x3x128xbf16, #tpu.memory_space<vmem>>, vector<1x1x3x128xbf16>
    %16 = vector.shape_cast %15 : vector<1x1x3x128xbf16> to vector<3x128xbf16>
    %cst_12 = arith.constant dense<0.000000e+00> : vector<64x128xf32>
    %17 = tpu.matmul %14, %16, %cst_12 {dimension_numbers = #tpu.dot_dimension_numbers<[1], [0], [0], [1], [0, 0, 1, 1], [], []>} : vector<64x3xbf16>, vector<3x128xbf16>, vector<64x128xf32> -> vector<64x128xf32>
    %18 = arith.addf %12, %17 : vector<64x128xf32>
    %19 = vector.extract_strided_slice %5 {offsets = [0, 2, 0], sizes = [8, 8, 3], strides = [1, 1, 1]} : vector<8x14x3xbf16> to vector<8x8x3xbf16>
    %20 = vector.shape_cast %19 : vector<8x8x3xbf16> to vector<64x3xbf16>
    %c0_13 = arith.constant 0 : index
    %c2 = arith.constant 2 : index
    %c0_14 = arith.constant 0 : index
    %c0_15 = arith.constant 0 : index
    %21 = vector.load %arg3[%c0_13, %c2, %c0_14, %c0_15] : memref<1x7x3x128xbf16, #tpu.memory_space<vmem>>, vector<1x1x3x128xbf16>
    %22 = vector.shape_cast %21 : vector<1x1x3x128xbf16> to vector<3x128xbf16>
    %cst_16 = arith.constant dense<0.000000e+00> : vector<64x128xf32>
    %23 = tpu.matmul %20, %22, %cst_16 {dimension_numbers = #tpu.dot_dimension_numbers<[1], [0], [0], [1], [0, 0, 1, 1], [], []>} : vector<64x3xbf16>, vector<3x128xbf16>, vector<64x128xf32> -> vector<64x128xf32>
    %24 = arith.addf %18, %23 : vector<64x128xf32>
    %25 = vector.extract_strided_slice %5 {offsets = [0, 3, 0], sizes = [8, 8, 3], strides = [1, 1, 1]} : vector<8x14x3xbf16> to vector<8x8x3xbf16>
    %26 = vector.shape_cast %25 : vector<8x8x3xbf16> to vector<64x3xbf16>
    %c0_17 = arith.constant 0 : index
    %c3 = arith.constant 3 : index
    %c0_18 = arith.constant 0 : index
    %c0_19 = arith.constant 0 : index
    %27 = vector.load %arg3[%c0_17, %c3, %c0_18, %c0_19] : memref<1x7x3x128xbf16, #tpu.memory_space<vmem>>, vector<1x1x3x128xbf16>
    %28 = vector.shape_cast %27 : vector<1x1x3x128xbf16> to vector<3x128xbf16>
    %cst_20 = arith.constant dense<0.000000e+00> : vector<64x128xf32>
    %29 = tpu.matmul %26, %28, %cst_20 {dimension_numbers = #tpu.dot_dimension_numbers<[1], [0], [0], [1], [0, 0, 1, 1], [], []>} : vector<64x3xbf16>, vector<3x128xbf16>, vector<64x128xf32> -> vector<64x128xf32>
    %30 = arith.addf %24, %29 : vector<64x128xf32>
    %31 = vector.extract_strided_slice %5 {offsets = [0, 4, 0], sizes = [8, 8, 3], strides = [1, 1, 1]} : vector<8x14x3xbf16> to vector<8x8x3xbf16>
    %32 = vector.shape_cast %31 : vector<8x8x3xbf16> to vector<64x3xbf16>
    %c0_21 = arith.constant 0 : index
    %c4 = arith.constant 4 : index
    %c0_22 = arith.constant 0 : index
    %c0_23 = arith.constant 0 : index
    %33 = vector.load %arg3[%c0_21, %c4, %c0_22, %c0_23] : memref<1x7x3x128xbf16, #tpu.memory_space<vmem>>, vector<1x1x3x128xbf16>
    %34 = vector.shape_cast %33 : vector<1x1x3x128xbf16> to vector<3x128xbf16>
    %cst_24 = arith.constant dense<0.000000e+00> : vector<64x128xf32>
    %35 = tpu.matmul %32, %34, %cst_24 {dimension_numbers = #tpu.dot_dimension_numbers<[1], [0], [0], [1], [0, 0, 1, 1], [], []>} : vector<64x3xbf16>, vector<3x128xbf16>, vector<64x128xf32> -> vector<64x128xf32>
    %36 = arith.addf %30, %35 : vector<64x128xf32>
    %37 = vector.extract_strided_slice %5 {offsets = [0, 5, 0], sizes = [8, 8, 3], strides = [1, 1, 1]} : vector<8x14x3xbf16> to vector<8x8x3xbf16>
    %38 = vector.shape_cast %37 : vector<8x8x3xbf16> to vector<64x3xbf16>
    %c0_25 = arith.constant 0 : index
    %c5 = arith.constant 5 : index
    %c0_26 = arith.constant 0 : index
    %c0_27 = arith.constant 0 : index
    %39 = vector.load %arg3[%c0_25, %c5, %c0_26, %c0_27] : memref<1x7x3x128xbf16, #tpu.memory_space<vmem>>, vector<1x1x3x128xbf16>
    %40 = vector.shape_cast %39 : vector<1x1x3x128xbf16> to vector<3x128xbf16>
    %cst_28 = arith.constant dense<0.000000e+00> : vector<64x128xf32>
    %41 = tpu.matmul %38, %40, %cst_28 {dimension_numbers = #tpu.dot_dimension_numbers<[1], [0], [0], [1], [0, 0, 1, 1], [], []>} : vector<64x3xbf16>, vector<3x128xbf16>, vector<64x128xf32> -> vector<64x128xf32>
    %42 = arith.addf %36, %41 : vector<64x128xf32>
    %43 = vector.extract_strided_slice %5 {offsets = [0, 6, 0], sizes = [8, 8, 3], strides = [1, 1, 1]} : vector<8x14x3xbf16> to vector<8x8x3xbf16>
    %44 = vector.shape_cast %43 : vector<8x8x3xbf16> to vector<64x3xbf16>
    %c0_29 = arith.constant 0 : index
    %c6 = arith.constant 6 : index
    %c0_30 = arith.constant 0 : index
    %c0_31 = arith.constant 0 : index
    %45 = vector.load %arg3[%c0_29, %c6, %c0_30, %c0_31] : memref<1x7x3x128xbf16, #tpu.memory_space<vmem>>, vector<1x1x3x128xbf16>
    %46 = vector.shape_cast %45 : vector<1x1x3x128xbf16> to vector<3x128xbf16>
    %cst_32 = arith.constant dense<0.000000e+00> : vector<64x128xf32>
    %47 = tpu.matmul %44, %46, %cst_32 {dimension_numbers = #tpu.dot_dimension_numbers<[1], [0], [0], [1], [0, 0, 1, 1], [], []>} : vector<64x3xbf16>, vector<3x128xbf16>, vector<64x128xf32> -> vector<64x128xf32>
    %48 = arith.addf %42, %47 : vector<64x128xf32>
    %c0_33 = arith.constant 0 : index
    %c0_34 = arith.constant 0 : index
    %49 = vector.load %arg6[%c0_33, %c0_34] : memref<64x128xf32, #tpu.memory_space<vmem>>, vector<64x128xf32>
    tpu.vector_store %arg6[%c0_33, %c0_34], %48 {strides = array<i32>} : memref<64x128xf32, #tpu.memory_space<vmem>>, vector<64x128xf32>,
    %c6_i32 = arith.constant 6 : i32
    %50 = arith.cmpi eq, %arg1, %c6_i32 : i32
    %51 = arith.extui %50 : i1 to i32
    %c0_i32_35 = arith.constant 0 : i32
    %52 = arith.cmpi ne, %51, %c0_i32_35 : i32
    scf.if %52 {
      %c0_36 = arith.constant 0 : index
      %c0_37 = arith.constant 0 : index
      %53 = vector.load %arg6[%c0_36, %c0_37] : memref<64x128xf32, #tpu.memory_space<vmem>>, vector<64x128xf32>
      %c0_38 = arith.constant 0 : index
      %c0_39 = arith.constant 0 : index
      %54 = vector.load %arg4[%c0_38, %c0_39] : memref<1x128xf32, #tpu.memory_space<vmem>>, vector<1x128xf32>
      %55 = vector.broadcast %54 : vector<1x128xf32> to vector<64x128xf32>
      %56 = arith.addf %53, %55 : vector<64x128xf32>
      %cst_40 = arith.constant 2.000000e+01 : f32
      %57 = vector.broadcast %cst_40 : f32 to vector<64x128xf32>
      %58 = arith.cmpf ogt, %56, %57 : vector<64x128xf32>
      %cst_41 = arith.constant 2.000000e+01 : f32
      %59 = vector.broadcast %cst_41 : f32 to vector<64x128xf32>
      %60 = arith.minimumf %56, %59 : vector<64x128xf32>
      %61 = math.exp %60 : vector<64x128xf32>
      %cst_42 = arith.constant 1.000000e+00 : f32
      %62 = vector.broadcast %cst_42 : f32 to vector<64x128xf32>
      %63 = arith.addf %62, %61 : vector<64x128xf32>
      %64 = math.log %63 : vector<64x128xf32>
      %65 = arith.select %58, %56, %64 : vector<64x128xi1>, vector<64x128xf32>
      %66 = math.tanh %65 : vector<64x128xf32>
      %67 = arith.mulf %56, %66 : vector<64x128xf32>
      %c0_43 = arith.constant 0 : index
      %c0_44 = arith.constant 0 : index
      %c0_45 = arith.constant 0 : index
      %68 = vector.load %arg5[%c0_43, %c0_44, %c0_45] : memref<1x64x128xf32, #tpu.memory_space<vmem>>, vector<1x64x128xf32>
      %69 = vector.shape_cast %68 : vector<1x64x128xf32> to vector<64x128xf32>
      %70 = vector.shape_cast %67 : vector<64x128xf32> to vector<1x64x128xf32>
      tpu.vector_store %arg5[%c0_43, %c0_44, %c0_45], %70 {strides = array<i32>} : memref<1x64x128xf32, #tpu.memory_space<vmem>>, vector<1x64x128xf32>,
    } else {
    }
    return
  }
  func.func @transform_0(%arg0: i32, %arg1: i32) -> (i32, i32, i32, i32) {
    %c0_i32 = arith.constant 0 : i32
    %c0_i32_0 = arith.constant 0 : i32
    %c0_i32_1 = arith.constant 0 : i32
    %c0_i32_2 = arith.constant 0 : i32
    return %arg0, %c0_i32, %c0_i32_0, %c0_i32_1 : i32, i32, i32, i32
  }
  func.func @transform_1(%arg0: i32, %arg1: i32) -> (i32, i32, i32, i32) {
    %c0_i32 = arith.constant 0 : i32
    %c0_i32_0 = arith.constant 0 : i32
    %c0_i32_1 = arith.constant 0 : i32
    %c0_i32_2 = arith.constant 0 : i32
    return %arg1, %c0_i32, %c0_i32_0, %c0_i32_1 : i32, i32, i32, i32
  }
  func.func @transform_2(%arg0: i32, %arg1: i32) -> (i32, i32) {
    %c0_i32 = arith.constant 0 : i32
    %c0_i32_0 = arith.constant 0 : i32
    %c0_i32_1 = arith.constant 0 : i32
    return %c0_i32, %c0_i32_0 : i32, i32
  }
  func.func @transform_3(%arg0: i32, %arg1: i32) -> (i32, i32, i32) {
    %c0_i32 = arith.constant 0 : i32
    %c0_i32_0 = arith.constant 0 : i32
    %c0_i32_1 = arith.constant 0 : i32
    return %arg0, %c0_i32, %c0_i32_0 : i32, i32, i32
  }
}

</mosaic_0001>

<bundles_post_ra>
// kernel: tpu_custom_call.1
= control target key start
LH: loop header
LB: loop body
LE: loop exit
PB: predicated region body
PF: predicated region fallthrough
CT: control target
= control target key end

     0   :  { %8 = vsyncpa [#allocation4], 0  ;;  %s2782_s0 = inlined_call_operand.vmem [shape: bf16[2,14,14,3], index: 0, kind: input, shape index: {}]   ;;  %s2783_s1 = inlined_call_operand.vmem [shape: bf16[7,7,3,128], index: 1, kind: input, shape index: {}]   ;;  %s2784_s2 = inlined_call_operand.vmem [shape: f32[1,128], index: 2, kind: input, shape index: {}]   ;;  %s2785_s3 = inlined_call_operand.hbm [shape: f32[2,64,128], index: 3, kind: output, shape index: {}]  }
   0x1   :  { %10 = vsyncpa [#allocation4 + $0x1], 0  ;;  %s2088_s12 = smov 0   ;;  %s2090_s13 = smov 0  }
   0x2   :  { %s2092_s14 = smov 0   ;;  %s2094_s15 = smov 0  }
   0x3   :  { %s2096_s16 = smov 0   ;;  %s2098_s17 = smov 0  }
   0x4   :  { %s2100_s18 = smov 0   ;;  %s2102_s19 = smov 0  }
   0x5 LB: > { %s1569_s20 = sadd.s32 4294967295, %s2061_s19   ;;  %s1570_s21 = sadd.s32 4294967294, %s2061_s19   ;;  %s2061_s19 = sphi %s2102_s19, %s16_s19   ;;  %s2057_s18 = sphi %s2100_s18, %s2832_s18   ;;  %s2053_s17 = sphi %s2098_s17, %s2831_s17   ;;  %s2049_s16 = sphi %s2096_s16, %s2830_s16   ;;  %s2045_s15 = sphi %s2094_s15, %s2829_s15   ;;  %s2041_s14 = sphi %s2092_s14, %s2828_s14   ;;  %s2037_s13 = sphi %s2090_s13, %s2827_s13   ;;  %s2033_s12 = sphi %s2088_s12, %s2826_s12  }
   0x6   : > { %s25_s22 = sadd.s32 1, %s2053_s17  ;;  %s28_s23 = sadd.s32 1, %s2057_s18 }
   0x7   : > { %p26_p0 = scmp.ge.s32.totalorder %s25_s22, 7  ;;  %p118_p1 = scmp.ne.s32.totalorder %s2041_s14, %s2037_s13 }
   0x8   : > { %p119_p2 = scmp.eq.s32.totalorder %s1569_s20, 13  ;;  %p124_p4 = scmp.ne.s32.totalorder %s2037_s13, %s2033_s12 }
   0x9   : > { %s2834_s22 = smov (%p26_p0, %s25_s22), 0  ;;  %s2836_s23 = smov (!%p26_p0, %s28_s23), %s2057_s18 }
   0xa   : > { %p2137_p3 = por %p119_p2, %p118_p1  ;;  %p30_p5 = scmp.ge.s32.totalorder %s2836_s23, 2 }
   0xb   : > { %p125_p6 = scmp.eq.s32.totalorder %s1570_s21, 13  ;;  %p1573_p7 = scmp.ge.s32.totalorder %s2061_s19, 1 }
   0xc   : > { %p162_p8 = scmp.lt.s32.totalorder %s2061_s19, 15  ;;  %s2838_s23 = smov (%p30_p5, %s2836_s23), 0 }
   0xd   : > { %p2147_p9 = por %p125_p6, %p124_p4  ;;  %s105_s26 = ssub.s32 %s2057_s18, %s2838_s23 }
   0xe   : > { %p163_p10 = pnand %p1573_p7, %p162_p8  ;;  %s108_s27 = sadd.s32 1, %s2041_s14 }
   0xf   : > { %p106_p11 = scmp.eq.s32.totalorder %s105_s26, 0 }
  0x10   : > { %166 = sbr.rel (%p163_p10) target bundleno = 429 (0x1ad), region = 32 }
  0x11   : > { %s2155_s28 = scalar_select %p106_p11, %s2041_s14, %s108_s27  }
  0x17   : > { %s188_s29 = sand.u32 1, %s2037_s13   ;;  %p191_p12 = scmp.lt.s32.totalorder %s2049_s16, 1 }
  0x18   : > { %s1574_s30 = sshll.u32 %s188_s29, 6  ;;  %p196_p13 = scmp.lt.s32.totalorder %s2045_s15, 6 }
  0x19   : > { %s192_s4 = scalar_select %p191_p12, %s2049_s16, 1 }
  0x1a   : > { %s197_s5 = scalar_select %p196_p13, %s2045_s15, 6 }
  0x1b   : > { %s1838_s6 = smul.u32 112, %s192_s4  ;;  %s2172_s26 = scalar_lea.vmem [#allocation3], %s1574_s30 }
  0x1c   : > { %s1839_s7 = smul.u32 14, %s197_s5  ;;  %p1577_p0 = scmp.ne.s32.totalorder %s2045_s15, 0 }
  0x1d   : > { %s195_s10 = scalar_lea.vmem %s2782_s0, %s1838_s6  ;;  %v2063_v0 = vmov (!%p1577_p0), 0.0  }
  0x1e   : > { %s2170_s21 = scalar_lea.vmem %s2783_s1, %s1839_s7  ;;  %205 = sbr.rel (%p1577_p0) target bundleno = 37 (0x25), region = 36  ;;  %206 = vst [vmem:[#allocation2] sm:$0xff] (!%p1577_p0), %v2063_v0  ;;  %207 = vst [vmem:[#allocation2 + $0x8] sm:$0xff] (!%p1577_p0), %v2063_v0 }
  0x1f   : > { %208 = vst [vmem:[#allocation2 + $0x10] sm:$0xff] (!%p1577_p0), %v2063_v0  ;;  %209 = vst [vmem:[#allocation2 + $0x18] sm:$0xff] (!%p1577_p0), %v2063_v0 }
  0x20   : > { %210 = vst [vmem:[#allocation2 + $0x20] sm:$0xff] (!%p1577_p0), %v2063_v0  ;;  %211 = vst [vmem:[#allocation2 + $0x28] sm:$0xff] (!%p1577_p0), %v2063_v0 }
  0x21   : > { %212 = vst [vmem:[#allocation2 + $0x30] sm:$0xff] (!%p1577_p0), %v2063_v0  ;;  %213 = vst [vmem:[#allocation2 + $0x38] sm:$0xff] (!%p1577_p0), %v2063_v0 }
  0x25 PF: > { %v241_v1 = vld [vmem:[%s2170_s21] sm:$0x3]  ;;  %vm275_vm0 = vcmask 1040384   ;;  %vm276_vm1 = vcmask 1041408   ;;  %v2064_v2 = vmov 65535   ;;  %s1673_s27 = sshll.u32 %s2045_s15, 3 }
  0x26   : > { %v277_v3 = vsel %vm275_vm0, 4294967295, %v2064_v2  ;;  %v1614_v4 = vld [vmem:[%s2170_s21 + $0x6] sm:$0x3]  ;;  %s2182_s30 = scalar_lea.vmem %s195_s10, %s1673_s27  ;;  %vm262_vm2 = vcmask 23552   ;;  %v1588_v6 = vld [vmem:[%s2170_s21 + $0x2] sm:$0x3] }
  0x27   : > { %v2180_v5 = vsel %vm276_vm1, %v277_v3, 0  ;;  %vm717_vm3 = vsmask.f32 2304  ;;  %v2187_v8 = vld [vmem:[%s2182_s30] sm:$0xf]  ;;  %v2798_v38 = vmov 0 }
  0x28   : > { %v280_v7 = vand.u32 %v2180_v5, %v241_v1  ;;  %v2190_v9 = vld [vmem:[%s2182_s30 + $0x8] sm:$0xf]  ;;  %v2193_v10 = vld [vmem:[%s2182_s30 + $0x10] sm:$0xf]  ;;  %v2196_v11 = vand.u32 %v1614_v4, %v2180_v5  ;;  %v497_v12 = vand.u32 %v1588_v6, %v2180_v5  ;;  %v2202_v14 = vld [vmem:[%s2182_s30 + $0x18] sm:$0xf] }
  0x29   : > { %v1580_v13 = vcombine.low %v2187_v8, %v2190_v9  ;;  %v2205_v15 = vld [vmem:[%s2182_s30 + $0x4] sm:$0x7]  ;;  %v2208_v16 = vld [vmem:[%s2182_s30 + $0xc] sm:$0x7]  ;;  %v1581_v17 = vcombine.low %v2193_v10, %v2202_v14  ;;  %v2214_v18 = vshrl.u32 %v2187_v8, 16  ;;  %v2217_v19 = vshll.u32 %v2187_v8, 16 }
  0x2a   : > { %1710 = vmatprep.subr.bf16.mxu1 %v280_v7  ;;  %1740 = vmatprep.subr.bf16.mxu0 %v2196_v11  ;;  %v2220_v20 = vshll.u32 %v2205_v15, 16  ;;  %v1631_v21 = vld [vmem:[%s2170_s21 + $0x8] sm:$0x3]  ;;  %v2225_v22 = vshrl.u32 %v2190_v9, 16  ;;  %v2228_v23 = vshll.u32 %v2190_v9, 16  ;;  %v2231_v24 = vshll.u32 %v2208_v16, 16 }
  0x2b   : > { %1711 = vmatpush3.bf16.msra.mxu1 %v280_v7  ;;  %1712 = vmatprep.mubr.msk.bf16.mxu1 %vm262_vm2, %v1580_v13  ;;  %vm718_vm4 = vsmask.f32 6416  ;;  %v720_v25 = vrot.slane %v2214_v18, 5  ;;  %v721_v26 = vrot.slane %v2217_v19, 6  ;;  %v724_v27 = vshrl.u32 %v2205_v15, 16  ;;  %p1666_p1 = scmp.ne.s32.totalorder %s2045_s15, 6 }
  0x2c   : > { %1741 = vmatpush3.bf16.msra.mxu0 %v2196_v11  ;;  %1720 = vmatprep.subr.bf16.mxu1 %v497_v12  ;;  %v727_v28 = vrot.slane %v2220_v20, 6  ;;  %v730_v29 = vrot.slane %v2225_v22, 5  ;;  %v731_v30 = vrot.slane %v2228_v23, 6  ;;  %v734_v31 = vshrl.u32 %v2208_v16, 16  ;;  %v2243_v33 = vld [vmem:[%s2182_s30 + $0x14] sm:$0x7]  ;;  %vm2253_vm5 = vmor %vm717_vm3, %vm718_vm4 }
  0x2d   : > { %v737_v32 = vrot.slane %v2231_v24, 6  ;;  %v722_v34 = vor.u32 %v721_v26, %v720_v25  ;;  %v726_v35 = vrot.slane %v724_v27, 5  ;;  %v2246_v36 = vrot.slane %v724_v27, 6  ;;  %v2260_v42 = vld [vmem:[%s2182_s30 + $0x1c] sm:$0x7] }
  0x2e   : > { %1713 = vmatmul.mubr.msk.bf16.vlgmr.msra.gmra.mrb[0].mxu1 %vm262_vm2, %v1581_v17  ;;  %v2249_v37 = vand.u32 %v1631_v21, %v2180_v5  ;;  %v2799_v38 = vsel %vm2253_vm5, 4294967295, %v2798_v38  ;;  %v732_v39 = vor.u32 %v731_v30, %v730_v29  ;;  %v736_v40 = vrot.slane %v734_v31, 5  ;;  %v2297_v4 = vld [vmem:[%s2182_s30 + $0x20] sm:$0xf]  ;;  %v2300_v6 = vld [vmem:[%s2182_s30 + $0x28] sm:$0xf] }
  0x2f   : > { %1721 = vmatpush3.bf16.msra.mxu1 %v497_v12  ;;  %2800 = vst [vmem:[#allocation6_spill] sm:$0xff] %v2799_v38  ;;  %v2257_v41 = vrot.slane %v734_v31, 6  ;;  %v2263_v43 = vshrl.u32 %v2193_v10, 16  ;;  %v723_v44 = vrot.slane %v722_v34, 4  ;;  %v728_v45 = vor.u32 %v727_v28, %v726_v35  ;;  %v2307_v21 = vld [vmem:[%s2182_s30 + $0x30] sm:$0xf] }
  0x30   : > { %1750 = vmatprep.subr.bf16.mxu0 %v2249_v37  ;;  %v2267_v46 = vshll.u32 %v2193_v10, 16  ;;  %v2270_v47 = vshll.u32 %v2243_v33, 16  ;;  %v733_v48 = vrot.slane %v732_v39, 4  ;;  %v738_v49 = vor.u32 %v737_v32, %v736_v40  ;;  %v2310_v29 = vld [vmem:[%s2182_s30 + $0x38] sm:$0xf] }
  0x31   : > { %v389_v50 = vrot.slane %v2263_v43, 4  ;;  %v2274_v51 = vshrl.u32 %v2202_v14, 16  ;;  %vm903_vm6 = vcmask 1045508   ;;  %v729_v52 = vsel %vm2253_vm5, %v723_v44, %v728_v45 }
  0x32   : > { %v392_v53 = vrot.slane %v2267_v46, 5  ;;  %v2280_v54 = vshll.u32 %v2202_v14, 16  ;;  %v2283_v55 = vshll.u32 %v2260_v42, 16  ;;  %v739_v56 = vsel %vm2253_vm5, %v733_v48, %v738_v49  ;;  %vm2334_vm9 = vmor %vm276_vm1, %vm903_vm6 }
  0x33   : > { %v403_v57 = vrot.slane %v2274_v51, 4  ;;  %v740_v58 = vrot.slane %v2263_v43, 5  ;;  %v741_v59 = vrot.slane %v2267_v46, 6  ;;  %v1615_v60 = vcombine.low %v729_v52, %v739_v56 }
  0x34   : > { %v406_v61 = vrot.slane %v2280_v54, 5  ;;  %v744_v62 = vshrl.u32 %v2243_v33, 16  ;;  %v747_v63 = vrot.slane %v2270_v47, 6  ;;  %v750_v1 = vrot.slane %v2274_v51, 5 }
  0x35   : > { %v742_v0 = vor.u32 %v741_v59, %v740_v58  ;;  %v751_v2 = vrot.slane %v2280_v54, 6  ;;  %v754_v3 = vshrl.u32 %v2260_v42, 16  ;;  %1742 = vmatprep.mubr.msk.bf16.mxu0 %vm262_vm2, %v1615_v60  ;;  %v757_v12 = vrot.slane %v2283_v55, 6 }
  0x36   : > { %v746_v7 = vrot.slane %v744_v62, 5  ;;  %v1062_v28 = vrot.slane %v744_v62, 6  ;;  %v1063_v31 = vrot.slane %v2270_v47, 7  ;;  %v1071_v44 = vrot.slane %v2283_v55, 7 }
  0x37   : > { %v743_v25 = vrot.slane %v742_v0, 4  ;;  %v752_v26 = vor.u32 %v751_v2, %v750_v1  ;;  %v756_v27 = vrot.slane %v754_v3, 5  ;;  %v1070_v40 = vrot.slane %v754_v3, 6 }
  0x38   : > { %v748_v30 = vor.u32 %v747_v63, %v746_v7  ;;  %v2318_v48 = vor.u32 %v1063_v31, %v1062_v28  ;;  %v1582_v49 = vcombine.low %v2297_v4, %v2300_v6  ;;  %v1583_v52 = vcombine.low %v2307_v21, %v2310_v29 }
  0x39   : > { %v753_v35 = vrot.slane %v752_v26, 4  ;;  %v758_v39 = vor.u32 %v757_v12, %v756_v27  ;;  %v2326_v58 = vor.u32 %v1071_v44, %v1070_v40  ;;  %vm355_vm7 = vsmask.f32 3328 }
  0x3a   : > { %v749_v45 = vsel %vm2253_vm5, %v743_v25, %v748_v30  ;;  %vm356_vm8 = vsmask.f32 7440  ;;  %1716 = vmatprep.mubr.msk.bf16.mxu1 %vm262_vm2, %v1582_v49  ;;  %v361_v60 = vrot.slane %v2214_v18, 4  ;;  %v364_v62 = vrot.slane %v2217_v19, 5  ;;  %v1640_v30 = vld [vmem:[%s2170_s21 + $0xa] sm:$0x3] }
  0x3b   : > { %v759_v56 = vsel %vm2253_vm5, %v753_v35, %v758_v39  ;;  %v370_v63 = vrot.slane %v2220_v20, 5  ;;  %1717 = vmatmul.mubr.msk.bf16.gmra.mrb[4].mxu1 %vm262_vm2, %v1583_v52  ;;  %v375_v1 = vrot.slane %v2225_v22, 4  ;;  %v378_v2 = vrot.slane %v2228_v23, 5  ;;  %vm2343_vm10 = vmor %vm355_vm7, %vm356_vm8 }
  0x3c   : > { %v1616_v59 = vcombine.low %v749_v45, %v759_v56  ;;  %v384_v3 = vrot.slane %v2231_v24, 5  ;;  %v393_v7 = vor.u32 %v392_v53, %v389_v50  ;;  %v365_v25 = vor.u32 %v364_v62, %v361_v60  ;;  %v1605_v45 = vld [vmem:[%s2170_s21 + $0x4] sm:$0x3] }
  0x3d   : > { %v398_v26 = vrot.slane %v2270_v47, 5  ;;  %v407_v27 = vor.u32 %v406_v61, %v403_v57  ;;  %v412_v28 = vrot.slane %v2283_v55, 5  ;;  %v379_v31 = vor.u32 %v378_v2, %v375_v1  ;;  %v2369_v60 = vld [vmem:[%s2182_s30 + $0x24] sm:$0x7] }
  0x3e   : > { %1743 = vmatmul.mubr.msk.bf16.vlgmr.msra.gmra.mrb[0].mxu0 %vm262_vm2, %v1616_v59  ;;  %v394_v35 = vrot.slane %v393_v7, 4  ;;  %v1623_v50 = vrot.slane %v2187_v8, 10  ;;  %v907_v53 = vrot.slane %v2205_v15, 6  ;;  %v366_v39 = vrot.slane %v365_v25, 4  ;;  %v2375_v25 = vld [vmem:[%s2182_s30 + $0x2c] sm:$0x7] }
  0x3f   : > { %1751 = vmatpush3.bf16.msra.mxu0 %v2249_v37  ;;  %v408_v40 = vrot.slane %v407_v27, 4  ;;  %v1624_v44 = vrot.slane %v2190_v9, 10  ;;  %v911_v47 = vrot.slane %v2208_v16, 6  ;;  %v380_v57 = vrot.slane %v379_v31, 4 }
  0x40   : > { %v399_v55 = vsel %vm2343_vm10, %v394_v35, %v398_v26  ;;  %v908_v37 = vsel %vm2334_vm9, %v1623_v50, %v907_v53  ;;  %v1133_v61 = vand.u32 %v1640_v30, %v2180_v5  ;;  %v371_v49 = vsel %vm2343_vm10, %v366_v39, %v370_v63 }
  0x41   : > { %v413_v52 = vsel %vm2343_vm10, %v408_v40, %v412_v28  ;;  %v912_v56 = vsel %vm2334_vm9, %v1624_v44, %v911_v47  ;;  %v1625_v59 = vrot.slane %v2193_v10, 10  ;;  %v385_v62 = vsel %vm2343_vm10, %v380_v57, %v384_v3  ;;  %v2405_v44 = vld [vmem:[%s2182_s30 + $0x34] sm:$0x7] }
  0x42   : > { %v1590_v1 = vcombine.low %v399_v55, %v413_v52  ;;  %v1632_v2 = vcombine.low %v908_v37, %v912_v56  ;;  %1760 = vmatprep.subr.bf16.mxu0 %v1133_v61  ;;  %v915_v7 = vrot.slane %v2243_v33, 6  ;;  %v1589_v63 = vcombine.low %v371_v49, %v385_v62 }
  0x43   : > { %v1626_v26 = vrot.slane %v2202_v14, 10  ;;  %v919_v27 = vrot.slane %v2260_v42, 6  ;;  %v642_v28 = vand.u32 %v1605_v45, %v2180_v5  ;;  %v2384_v30 = vshrl.u32 %v2297_v4, 16  ;;  %v2412_v45 = vld [vmem:[%s2182_s30 + $0x3c] sm:$0x7] }
  0x44   : > { %1752 = vmatprep.mubr.msk.bf16.mxu0 %vm262_vm2, %v1632_v2  ;;  %v916_v3 = vsel %vm2334_vm9, %v1625_v59, %v915_v7  ;;  %v2387_v31 = vshll.u32 %v2297_v4, 16  ;;  %v2390_v35 = vshll.u32 %v2369_v60, 16  ;;  %1722 = vmatprep.mubr.msk.bf16.mxu1 %vm262_vm2, %v1589_v63  ;;  %v2396_v53 = vshrl.u32 %v2300_v6, 16 }
  0x45   : > { %v920_v50 = vsel %vm2334_vm9, %v1626_v26, %v919_v27  ;;  %1730 = vmatprep.subr.bf16.mxu1 %v642_v28  ;;  %v2399_v39 = vshll.u32 %v2300_v6, 16  ;;  %v2402_v40 = vshll.u32 %v2375_v25, 16  ;;  %1723 = vmatmul.mubr.msk.bf16.vlgmr.msra.gmra.mrb[0].mxu1 %vm262_vm2, %v1590_v1  ;;  %v417_v57 = vrot.slane %v2384_v30, 4 }
  0x46   : > { %2805 = vst [vmem:[#allocation7_spill] sm:$0xff] %v2396_v53  ;;  %v1633_v47 = vcombine.low %v916_v3, %v920_v50  ;;  %v420_v55 = vrot.slane %v2387_v31, 5  ;;  %v426_v37 = vrot.slane %v2390_v35, 5  ;;  %1731 = vmatpush3.bf16.msra.mxu1 %v642_v28  ;;  %v431_v49 = vrot.slane %v2396_v53, 4 }
  0x47   : > { %2806 = vst [vmem:[#allocation8_spill] sm:$0xff] %v2399_v39  ;;  %2807 = vst [vmem:[#allocation9_spill] sm:$0xff] %v2402_v40  ;;  %v434_v52 = vrot.slane %v2399_v39, 5  ;;  %v440_v56 = vrot.slane %v2402_v40, 5  ;;  %v2418_v59 = vshrl.u32 %v2307_v21, 16  ;;  %v2421_v1 = vshll.u32 %v2307_v21, 16  ;;  %1780 = vmatprep.subr.bf16.mxu1 %v2196_v11 }
  0x48   : > { %v421_v62 = vor.u32 %v420_v55, %v417_v57  ;;  %v2424_v2 = vshll.u32 %v2405_v44, 16  ;;  %v2427_v7 = vshrl.u32 %v2310_v29, 16  ;;  %vm580_vm11 = vcmask 1042432  }
  0x49   : > { %2808 = vst [vmem:[#allocation10_spill] sm:$0xff] %v2418_v59  ;;  %v435_v63 = vor.u32 %v434_v52, %v431_v49  ;;  %v445_v26 = vrot.slane %v2418_v59, 4  ;;  %v2433_v27 = vshll.u32 %v2310_v29, 16  ;;  %v2436_v28 = vshll.u32 %v2412_v45, 16 }
  0x4a   : > { %1753 = vmatmul.mubr.msk.bf16.vlgmr.msra.gmra.mrb[0].mxu0 %vm262_vm2, %v1633_v47  ;;  %v422_v3 = vrot.slane %v421_v62, 4  ;;  %v448_v50 = vrot.slane %v2421_v1, 5  ;;  %v454_v57 = vrot.slane %v2424_v2, 5  ;;  %v459_v55 = vrot.slane %v2427_v7, 4 }
  0x4b   : > { %1761 = vmatpush3.bf16.msra.mxu0 %v1133_v61  ;;  %v436_v34 = vrot.slane %v435_v63, 4  ;;  %v462_v47 = vrot.slane %v2433_v27, 5  ;;  %v468_v49 = vrot.slane %v2436_v28, 5  ;;  %v781_v61 = vrot.slane %v2421_v1, 6 }
  0x4c   : > { %v427_v32 = vsel %vm2343_vm10, %v422_v3, %v426_v37  ;;  %v449_v17 = vor.u32 %v448_v50, %v445_v26  ;;  %v787_v62 = vrot.slane %v2424_v2, 6  ;;  %v790_v63 = vrot.slane %v2427_v7, 5 }
  0x4d   : > { %v441_v13 = vsel %vm2343_vm10, %v436_v34, %v440_v56  ;;  %v463_v38 = vor.u32 %v462_v47, %v459_v55  ;;  %v797_v52 = vrot.slane %v2436_v28, 6  ;;  %v1627_v59 = vrot.slane %v2297_v4, 10 }
  0x4e   : > { %v1591_v39 = vcombine.low %v427_v32, %v441_v13  ;;  %v450_v53 = vrot.slane %v449_v17, 4  ;;  %v923_v26 = vrot.slane %v2369_v60, 6  ;;  %v1628_v3 = vrot.slane %v2300_v6, 10 }
  0x4f   : > { %v464_v37 = vrot.slane %v463_v38, 4  ;;  %v927_v50 = vrot.slane %v2375_v25, 6  ;;  %v1629_v56 = vrot.slane %v2307_v21, 10  ;;  %v931_v13 = vrot.slane %v2405_v44, 6 }
  0x50   : > { %1726 = vmatprep.mubr.msk.bf16.mxu1 %vm262_vm2, %v1591_v39  ;;  %v455_v34 = vsel %vm2343_vm10, %v450_v53, %v454_v57  ;;  %v1630_v17 = vrot.slane %v2310_v29, 10  ;;  %v924_v32 = vsel %vm2334_vm9, %v1627_v59, %v923_v26  ;;  %v935_v39 = vrot.slane %v2412_v45, 6  ;;  %v2820_v12 = vld [vmem:[#allocation10_spill] sm:$0xff] }
  0x51   : > { %v469_v38 = vsel %vm2343_vm10, %v464_v37, %v468_v49  ;;  %v928_v55 = vsel %vm2334_vm9, %v1628_v3, %v927_v50  ;;  %v932_v53 = vsel %vm2334_vm9, %v1629_v56, %v931_v13  ;;  %vm581_vm12 = vcmask 1046532  }
  0x52   : > { %v1592_v47 = vcombine.low %v455_v34, %v469_v38  ;;  %v1634_v40 = vcombine.low %v924_v32, %v928_v55  ;;  %v936_v57 = vsel %vm2334_vm9, %v1630_v17, %v935_v39  ;;  %vm2475_vm13 = vmor %vm580_vm11, %vm581_vm12  ;;  %v1597_v59 = vrot.slane %v2187_v8, 9  ;;  %v1657_v32 = vld [vmem:[%s2170_s21 + $0xc] sm:$0x3] }
  0x53   : > { %v585_v49 = vrot.slane %v2205_v15, 5  ;;  %v1598_v37 = vrot.slane %v2190_v9, 9  ;;  %v1635_v26 = vcombine.low %v932_v53, %v936_v57  ;;  %v589_v0 = vrot.slane %v2208_v16, 5 }
  0x54   : > { %1727 = vmatmul.mubr.msk.bf16.gmra.mrb[4].mxu1 %vm262_vm2, %v1592_v47  ;;  %1756 = vmatprep.mubr.msk.bf16.mxu0 %vm262_vm2, %v1634_v40  ;;  %v1599_v3 = vrot.slane %v2193_v10, 9  ;;  %v593_v50 = vrot.slane %v2243_v33, 5  ;;  %v1600_v56 = vrot.slane %v2202_v14, 9  ;;  %v597_v13 = vrot.slane %v2260_v42, 5 }
  0x55   : > { %v586_v34 = vsel %vm2475_vm13, %v1597_v59, %v585_v49  ;;  %vm1039_vm14 = vsmask.f32 1280  ;;  %1757 = vmatmul.mubr.msk.bf16.gmra.mrb[4].mxu0 %vm262_vm2, %v1635_v26  ;;  %v590_v40 = vsel %vm2475_vm13, %v1598_v37, %v589_v0  ;;  %vm1040_vm15 = vsmask.f32 5392 }
  0x56   : > { %v594_v17 = vsel %vm2475_vm13, %v1599_v3, %v593_v50  ;;  %v1042_v38 = vrot.slane %v2214_v18, 6  ;;  %v1606_v55 = vcombine.low %v586_v34, %v590_v40  ;;  %v598_v39 = vsel %vm2475_vm13, %v1600_v56, %v597_v13  ;;  %vm2514_vm1 = vmor %vm1039_vm14, %vm1040_vm15 }
  0x57   : > { %v1043_v47 = vrot.slane %v2217_v19, 7  ;;  %v1047_v53 = vrot.slane %v2220_v20, 7  ;;  %v1607_v57 = vcombine.low %v594_v17, %v598_v39  ;;  %v1050_v59 = vrot.slane %v2225_v22, 6 }
  0x58   : > { %v1051_v49 = vrot.slane %v2228_v23, 7  ;;  %v1055_v37 = vrot.slane %v2231_v24, 7  ;;  %1732 = vmatprep.mubr.msk.bf16.mxu1 %vm262_vm2, %v1606_v55  ;;  %v1270_v0 = vand.u32 %v1657_v32, %v2180_v5  ;;  %v2811_v3 = vrot.slane %v2263_v43, 6 }
  0x59   : > { %v1044_v26 = vor.u32 %v1043_v47, %v1042_v38  ;;  %v1048_v18 = vor.u32 %v1047_v53, %v2246_v36  ;;  %v2812_v19 = vrot.slane %v2267_v46, 7  ;;  %v2815_v24 = vrot.slane %v2274_v51, 6 }
  0x5a   : > { %v1052_v22 = vor.u32 %v1051_v49, %v1050_v59  ;;  %v1056_v23 = vor.u32 %v1055_v37, %v2257_v41  ;;  %v2816_v36 = vrot.slane %v2280_v54, 7  ;;  %v1601_v5 = vrot.slane %v2297_v4, 9  ;;  %1770 = vmatprep.subr.bf16.mxu0 %v1270_v0 }
  0x5b   : > { %v1060_v50 = vor.u32 %v2812_v19, %v2811_v3  ;;  %v1045_v43 = vrot.slane %v1044_v26, 4  ;;  %v601_v56 = vrot.slane %v2369_v60, 5  ;;  %v1602_v13 = vrot.slane %v2300_v6, 9 }
  0x5c   : > { %v1068_v34 = vor.u32 %v2816_v36, %v2815_v24  ;;  %1733 = vmatmul.mubr.msk.bf16.vlgmr.msra.gmra.mrb[0].mxu1 %vm262_vm2, %v1607_v57  ;;  %v1053_v40 = vrot.slane %v1052_v22, 4  ;;  %v605_v41 = vrot.slane %v2375_v25, 5  ;;  %v1603_v51 = vrot.slane %v2307_v21, 9 }
  0x5d   : > { %v1061_v46 = vrot.slane %v1060_v50, 4  ;;  %v1049_v54 = vsel %vm2514_vm1, %v1045_v43, %v1048_v18  ;;  %1781 = vmatpush3.bf16.msra.mxu1 %v2196_v11  ;;  %v602_v32 = vsel %vm2475_vm13, %v1601_v5, %v601_v56  ;;  %v609_v55 = vrot.slane %v2405_v44, 5  ;;  %v2817_v50 = vld [vmem:[#allocation7_spill] sm:$0xff]  ;;  %v2819_v43 = vld [vmem:[#allocation9_spill] sm:$0xff] }
  0x5e   : > { %v1069_v17 = vrot.slane %v1068_v34, 4  ;;  %vm1209_vm3 = vcmask 1044484   ;;  %v1057_v39 = vsel %vm2514_vm1, %v1053_v40, %v1056_v23  ;;  %v606_v53 = vsel %vm2475_vm13, %v1602_v13, %v605_v41  ;;  %v2818_v23 = vld [vmem:[#allocation8_spill] sm:$0xff] }
  0x5f   : > { %v1065_v38 = vsel %vm2514_vm1, %v1061_v46, %v2318_v48  ;;  %v1604_v48 = vrot.slane %v2310_v29, 9  ;;  %v1641_v57 = vcombine.low %v1049_v54, %v1057_v39  ;;  %v1608_v59 = vcombine.low %v602_v32, %v606_v53  ;;  %vm2584_vm4 = vmor %vm275_vm0, %vm1209_vm3 }
  0x60   : > { %v1073_v47 = vsel %vm2514_vm1, %v1069_v17, %v2326_v58  ;;  %v610_v49 = vsel %vm2475_vm13, %v1603_v51, %v609_v55  ;;  %v613_v37 = vrot.slane %v2412_v45, 5  ;;  %v764_v26 = vshrl.u32 %v2369_v60, 16 }
  0x61   : > { %v1642_v11 = vcombine.low %v1065_v38, %v1073_v47  ;;  %v774_v18 = vshrl.u32 %v2375_v25, 16  ;;  %v1074_v3 = vrot.slane %v2384_v30, 6  ;;  %1762 = vmatprep.mubr.msk.bf16.mxu0 %vm262_vm2, %v1641_v57  ;;  %1736 = vmatprep.mubr.msk.bf16.mxu1 %vm262_vm2, %v1608_v59  ;;  %v1075_v58 = vrot.slane %v2387_v31, 7 }
  0x62   : > { %v1079_v19 = vrot.slane %v2390_v35, 7  ;;  %v1082_v22 = vrot.slane %v2817_v50, 6  ;;  %v1083_v24 = vrot.slane %v2818_v23, 7  ;;  %v614_v36 = vsel %vm2475_vm13, %v1604_v48, %v613_v37 }
  0x63   : > { %1763 = vmatmul.mubr.msk.bf16.vlgmr.msra.gmra.mrb[0].mxu0 %vm262_vm2, %v1642_v11  ;;  %v1078_v34 = vrot.slane %v764_v26, 6  ;;  %v1086_v5 = vrot.slane %v774_v18, 6  ;;  %v1087_v46 = vrot.slane %v2819_v43, 7  ;;  %v1609_v56 = vcombine.low %v610_v49, %v614_v36 }
  0x64   : > { %1771 = vmatpush3.bf16.msra.mxu0 %v1270_v0  ;;  %v1076_v13 = vor.u32 %v1075_v58, %v1074_v3  ;;  %v1084_v40 = vor.u32 %v1083_v24, %v1082_v22  ;;  %v784_v17 = vshrl.u32 %v2405_v44, 16  ;;  %v794_v54 = vshrl.u32 %v2412_v45, 16 }
  0x65   : > { %v1080_v41 = vor.u32 %v1079_v19, %v1078_v34  ;;  %v1088_v51 = vor.u32 %v1087_v46, %v1086_v5  ;;  %v1090_v38 = vrot.slane %v2820_v12, 6  ;;  %1737 = vmatmul.mubr.msk.bf16.gmra.mrb[4].mxu1 %vm262_vm2, %v1609_v56  ;;  %v1091_v47 = vrot.slane %v2421_v1, 7 }
  0x66   : > { %v1077_v32 = vrot.slane %v1076_v13, 4  ;;  %v1085_v55 = vrot.slane %v1084_v40, 4  ;;  %v786_v39 = vrot.slane %v784_v17, 5  ;;  %v796_v53 = vrot.slane %v794_v54, 5 }
  0x67   : > { %v1094_v0 = vrot.slane %v784_v17, 6  ;;  %v1095_v48 = vrot.slane %v2424_v2, 7  ;;  %v1098_v57 = vrot.slane %v2427_v7, 6  ;;  %v1092_v37 = vor.u32 %v1091_v47, %v1090_v38 }
  0x68   : > { %v1081_v11 = vsel %vm2514_vm1, %v1077_v32, %v1080_v41  ;;  %v1089_v59 = vsel %vm2514_vm1, %v1085_v55, %v1088_v51  ;;  %v788_v49 = vor.u32 %v787_v62, %v786_v39  ;;  %v798_v58 = vor.u32 %v797_v52, %v796_v53 }
  0x69   : > { %v1643_v3 = vcombine.low %v1081_v11, %v1089_v59  ;;  %v1096_v19 = vor.u32 %v1095_v48, %v1094_v0  ;;  %v1099_v22 = vrot.slane %v2433_v27, 7  ;;  %v1093_v36 = vrot.slane %v1092_v37, 4 }
  0x6a   : > { %v1102_v34 = vrot.slane %v794_v54, 6  ;;  %v1103_v5 = vrot.slane %v2436_v28, 7  ;;  %v1649_v2 = vrot.slane %v2187_v8, 11  ;;  %v1213_v52 = vrot.slane %v2205_v15, 7 }
  0x6b   : > { %1766 = vmatprep.mubr.msk.bf16.mxu0 %vm262_vm2, %v1643_v3  ;;  %v1100_v62 = vor.u32 %v1099_v22, %v1098_v57  ;;  %v1650_v46 = vrot.slane %v2190_v9, 11  ;;  %v1217_v56 = vrot.slane %v2208_v16, 7  ;;  %v1097_v13 = vsel %vm2514_vm1, %v1093_v36, %v1096_v19 }
  0x6c   : > { %v1104_v40 = vor.u32 %v1103_v5, %v1102_v34  ;;  %v1651_v17 = vrot.slane %v2193_v10, 11  ;;  %v1221_v41 = vrot.slane %v2243_v33, 7  ;;  %v1214_v8 = vsel %vm2584_vm4, %v1649_v2, %v1213_v52 }
  0x6d   : > { %v1101_v28 = vrot.slane %v1100_v62, 4  ;;  %v1218_v51 = vsel %vm2584_vm4, %v1650_v46, %v1217_v56  ;;  %v1652_v15 = vrot.slane %v2202_v14, 11  ;;  %v1225_v54 = vrot.slane %v2260_v42, 7  ;;  %v235_v46 = vld [vmem:[#allocation2 + $0x10] sm:$0xff]  ;;  %v236_v56 = vld [vmem:[#allocation2 + $0x18] sm:$0xff] }
  0x6e   : > { %v1658_v9 = vcombine.low %v1214_v8, %v1218_v51  ;;  %v1222_v16 = vsel %vm2584_vm4, %v1651_v17, %v1221_v41  ;;  %v760_v38 = vrot.slane %v2384_v30, 5  ;;  %v761_v33 = vrot.slane %v2387_v31, 6 }
  0x6f   : > { %v1105_v10 = vsel %vm2514_vm1, %v1101_v28, %v1104_v40  ;;  %v766_v32 = vrot.slane %v764_v26, 5  ;;  %v767_v55 = vrot.slane %v2390_v35, 6  ;;  %v1226_v14 = vsel %vm2584_vm4, %v1652_v15, %v1225_v54  ;;  %v234_v40 = vld [vmem:[#allocation2 + $0x8] sm:$0xff] }
  0x70   : > { %v1644_v39 = vcombine.low %v1097_v13, %v1105_v10  ;;  %v770_v47 = vrot.slane %v2817_v50, 5  ;;  %v771_v42 = vrot.slane %v2818_v23, 6  ;;  %v1659_v53 = vcombine.low %v1222_v16, %v1226_v14  ;;  %v237_v14 = vld [vmem:[#allocation2 + $0x20] sm:$0xff] }
  0x71   : > { %v762_v30 = vor.u32 %v761_v33, %v760_v38  ;;  %v768_v0 = vor.u32 %v767_v55, %v766_v32  ;;  %v776_v20 = vrot.slane %v774_v18, 5  ;;  %v777_v26 = vrot.slane %v2819_v43, 6  ;;  %v239_v55 = vld [vmem:[#allocation2 + $0x30] sm:$0xff] }
  0x72   : > { %1767 = vmatmul.mubr.msk.bf16.gmra.mrb[4].mxu0 %vm262_vm2, %v1644_v39  ;;  %v772_v31 = vor.u32 %v771_v42, %v770_v47  ;;  %v2823_v35 = vrot.slane %v2820_v12, 5  ;;  %v2824_v50 = vrot.slane %v2433_v27, 6  ;;  %v1653_v18 = vrot.slane %v2297_v4, 11  ;;  %v240_v47 = vld [vmem:[#allocation2 + $0x38] sm:$0xff] }
  0x73   : > { %1772 = vmatprep.mubr.msk.bf16.mxu0 %vm262_vm2, %v1658_v9  ;;  %v763_v57 = vrot.slane %v762_v30, 4  ;;  %v1229_v11 = vrot.slane %v2369_v60, 7  ;;  %v1654_v59 = vrot.slane %v2300_v6, 11  ;;  %v778_v37 = vor.u32 %v777_v26, %v776_v20 }
  0x74   : > { %v782_v48 = vor.u32 %v781_v61, %v2823_v35  ;;  %v792_v23 = vor.u32 %v2824_v50, %v790_v63  ;;  %v773_v43 = vrot.slane %v772_v31, 4  ;;  %v1233_v27 = vrot.slane %v2375_v25, 7 }
  0x75   : > { %v769_v61 = vsel %vm2253_vm5, %v763_v57, %v768_v0  ;;  %v1230_v7 = vsel %vm2584_vm4, %v1653_v18, %v1229_v11  ;;  %v1655_v63 = vrot.slane %v2307_v21, 11  ;;  %v1237_v19 = vrot.slane %v2405_v44, 7 }
  0x76   : > { %v783_v12 = vrot.slane %v782_v48, 4  ;;  %v793_v3 = vrot.slane %v792_v23, 4  ;;  %v779_v4 = vsel %vm2253_vm5, %v773_v43, %v778_v37  ;;  %v1234_v34 = vsel %vm2584_vm4, %v1654_v59, %v1233_v27  ;;  %v1667_v59 = vld [vmem:[%s2784_s2] ss:$0 sm:$0xff] (!%p1666_p1) }
  0x77   : > { %v1617_v22 = vcombine.low %v769_v61, %v779_v4  ;;  %v1656_v25 = vrot.slane %v2310_v29, 11  ;;  %v1660_v5 = vcombine.low %v1230_v7, %v1234_v34  ;;  %v1238_v21 = vsel %vm2584_vm4, %v1655_v63, %v1237_v19 }
  0x78   : > { %v789_v6 = vsel %vm2253_vm5, %v783_v12, %v788_v49  ;;  %v799_v60 = vsel %vm2253_vm5, %v793_v3, %v798_v58  ;;  %v1241_v2 = vrot.slane %v2412_v45, 7  ;;  %v233_v45 = vld [vmem:[#allocation2] sm:$0xff] }
  0x79   : > { %v1618_v36 = vcombine.low %v789_v6, %v799_v60  ;;  %1746 = vmatprep.mubr.msk.bf16.mxu1 %vm262_vm2, %v1617_v22 }
  0x7a   : > { %1773 = vmatmul.mubr.msk.bf16.vlgmr.msra.gmra.mrb[0].mxu0 %vm262_vm2, %v1659_v53  ;;  %v1242_v44 = vsel %vm2584_vm4, %v1656_v25, %v1241_v2  ;;  %v238_v53 = vld [vmem:[#allocation2 + $0x28] sm:$0xff] }
  0x7b   : > { %1747 = vmatmul.mubr.msk.bf16.vlgmr.msra.gmra.mrb[4].mxu1 %vm262_vm2, %v1618_v36  ;;  %1776 = vmatprep.mubr.msk.bf16.mxu0 %vm262_vm2, %v1660_v5  ;;  %v1661_v49 = vcombine.low %v1238_v21, %v1242_v44 }
  0x82   : > { %1777 = vmatmul.mubr.msk.bf16.gmra.mrb[4].mxu0 %vm262_vm2, %v1661_v49 }
 0x12f   : > { %v1734_v29 = vpop.f32.mrb[0].mxu1 }
 0x130   : > { %v678_v58 = vpop.f32.mrb[1].mxu1  ;;  %v1782_v13 = vadd.f32 %v1734_v29, %v235_v46 }
 0x131   : > { %v1735_v62 = vpop.f32.mrb[2].mxu1  ;;  %v1784_v17 = vadd.f32 %v678_v58, %v233_v45 }
 0x132   : > { %v681_v52 = vpop.f32.mrb[3].mxu1  ;;  %v1786_v8 = vadd.f32 %v1735_v62, %v236_v56 }
 0x133   : > { %v1788_v9 = vadd.f32 %v681_v52, %v234_v40 }
 0x14d   : > { %v1774_v41 = vpop.f32.mrb[0].mxu0 }
 0x14e   : > { %v1748_v28 = vpop.f32.mrb[4].mxu1  ;;  %v1783_v24 = vadd.f32 %v1782_v13, %v1774_v41  ;;  %v1306_v51 = vpop.f32.mrb[1].mxu0 }
 0x14f   : > { %v879_v15 = vpop.f32.mrb[5].mxu1  ;;  %v1785_v16 = vadd.f32 %v1784_v17, %v1306_v51  ;;  %v1775_v54 = vpop.f32.mrb[2].mxu0  ;;  %v1790_v42 = vadd.f32 %v1748_v28, %v239_v55 }
 0x150   : > { %v1749_v38 = vpop.f32.mrb[6].mxu1  ;;  %1347 = vst [vmem:[#allocation2 + $0x10] sm:$0xff] %v1783_v24  ;;  %v1787_v10 = vadd.f32 %v1786_v8, %v1775_v54  ;;  %v1309_v33 = vpop.f32.mrb[3].mxu0  ;;  %v1792_v30 = vadd.f32 %v879_v15, %v237_v14 }
 0x151   : > { %v882_v32 = vpop.f32.mrb[7].mxu1  ;;  %1345 = vst [vmem:[#allocation2] sm:$0xff] %v1785_v16  ;;  %v1789_v39 = vadd.f32 %v1788_v9, %v1309_v33  ;;  %v1794_v20 = vadd.f32 %v1749_v38, %v240_v47 }
 0x152   : > { %1348 = vst [vmem:[#allocation2 + $0x18] sm:$0xff] %v1787_v10  ;;  %v1796_v35 = vadd.f32 %v882_v32, %v238_v53 }
 0x153   : > { %1346 = vst [vmem:[#allocation2 + $0x8] sm:$0xff] %v1789_v39 }
 0x155   : > { %v1778_v0 = vpop.f32.mrb[4].mxu0  ;;  %1356 = sbr.rel (%p1666_p1) target bundleno = 404 (0x194), region = 40 }
 0x156   : > { %v1791_v31 = vadd.f32 %v1790_v42, %v1778_v0  ;;  %v1322_v26 = vpop.f32.mrb[5].mxu0 }
 0x157   : > { %v1793_v48 = vadd.f32 %v1792_v30, %v1322_v26  ;;  %v1779_v50 = vpop.f32.mrb[6].mxu0  ;;  %v1359_v3 = vld [vmem:[#allocation2 + $0x10] sm:$0xff] (!%p1666_p1) }
 0x158   : > { %1351 = vst [vmem:[#allocation2 + $0x30] sm:$0xff] %v1791_v31  ;;  %v1795_v23 = vadd.f32 %v1794_v20, %v1779_v50  ;;  %v1325_v57 = vpop.f32.mrb[7].mxu0  ;;  %v1357_v11 = vld [vmem:[#allocation2] sm:$0xff] (!%p1666_p1)  ;;  %v2667_v7 = vadd.f32 (!%p1666_p1), %v1667_v59, %v1359_v3 }
 0x159   : > { %1349 = vst [vmem:[#allocation2 + $0x20] sm:$0xff] %v1793_v48  ;;  %v1797_v18 = vadd.f32 %v1796_v35, %v1325_v57  ;;  %v2663_v37 = vadd.f32 (!%p1666_p1), %v1667_v59, %v1357_v11  ;;  %v1360_v1 = vld [vmem:[#allocation2 + $0x18] sm:$0xff] (!%p1666_p1) }
 0x15a   : > { %1352 = vst [vmem:[#allocation2 + $0x38] sm:$0xff] %v1795_v23  ;;  %v1358_v43 = vld [vmem:[#allocation2 + $0x8] sm:$0xff] (!%p1666_p1)  ;;  %v2669_v27 = vadd.f32 (!%p1666_p1), %v1667_v59, %v1360_v1  ;;  %v1390_v22 = vmin.f32 (!%p1666_p1), %v2667_v7, 20.0  ;;  %vm1382_vm5 = vcmp.gt.f32.partialorder (!%p1666_p1), %v2667_v7, 20.0 }
 0x15b   : > { %1350 = vst [vmem:[#allocation2 + $0x28] sm:$0xff] %v1797_v18  ;;  %v2665_v12 = vadd.f32 (!%p1666_p1), %v1667_v59, %v1358_v43  ;;  %v1388_v4 = vmin.f32 (!%p1666_p1), %v2663_v37, 20.0  ;;  %vm1380_vm0 = vcmp.gt.f32.partialorder (!%p1666_p1), %v2663_v37, 20.0 }
 0x15c   : > { %v1391_v36 = vmin.f32 %v2669_v27, 20.0  ;;  %v1400_v2 = vmul.f32 1.442695, %v1390_v22  ;;  %vm1383_vm6 = vcmp.gt.f32.partialorder %v2669_v27, 20.0 }
 0x15d   : > { %v1389_v6 = vmin.f32 %v2665_v12, 20.0  ;;  %v1396_v25 = vmul.f32 1.442695, %v1388_v4  ;;  %vm1381_vm2 = vcmp.gt.f32.partialorder %v2665_v12, 20.0 }
 0x15e   : > { %v1402_v44 = vmul.f32 1.442695, %v1391_v36 }
 0x15f   : > { %v1363_v19 = vld [vmem:[#allocation2 + $0x30] sm:$0xff]  ;;  %v1398_v5 = vmul.f32 1.442695, %v1389_v6  ;;  %1919 = vpow2.f32 %v1396_v25 }
 0x160   : > { %v1361_v61 = vld [vmem:[#allocation2 + $0x20] sm:$0xff]  ;;  %v2680_v29 = vadd.f32 %v1667_v59, %v1363_v19 }
 0x161   : > { %v2671_v63 = vadd.f32 %v1667_v59, %v1361_v61  ;;  %v1364_v34 = vld [vmem:[#allocation2 + $0x38] sm:$0xff]  ;;  %1921 = vpow2.f32 %v1398_v5 }
 0x162   : > { %v1362_v60 = vld [vmem:[#allocation2 + $0x28] sm:$0xff]  ;;  %v2682_v62 = vadd.f32 %v1667_v59, %v1364_v34  ;;  %1923 = vpow2.f32 %v1400_v2  ;;  %v1394_v46 = vmin.f32 %v2680_v29, 20.0  ;;  %vm1386_vm9 = vcmp.gt.f32.partialorder %v2680_v29, 20.0 }
 0x163   : > { %v1392_v21 = vmin.f32 %v2671_v63, 20.0  ;;  %v2678_v49 = vadd.f32 %v1667_v59, %v1362_v60  ;;  %1925 = vpow2.f32 %v1402_v44  ;;  %vm1384_vm7 = vcmp.gt.f32.partialorder %v2671_v63, 20.0 }
 0x164   : > { %v1395_v45 = vmin.f32 %v2682_v62, 20.0  ;;  %v1408_v13 = vmul.f32 1.442695, %v1394_v46  ;;  %vm1387_vm10 = vcmp.gt.f32.partialorder %v2682_v62, 20.0 }
 0x165   : > { %v1404_v58 = vmul.f32 1.442695, %v1392_v21  ;;  %v1393_v52 = vmin.f32 %v2678_v49, 20.0  ;;  %vm1385_vm8 = vcmp.gt.f32.partialorder %v2678_v49, 20.0 }
 0x166   : > { %v1410_v40 = vmul.f32 1.442695, %v1395_v45 }
 0x167   : > { %v1406_v56 = vmul.f32 1.442695, %v1393_v52  ;;  %1927 = vpow2.f32 %v1404_v58 }
 0x169   : > { %1929 = vpow2.f32 %v1406_v56  ;;  %v1920_v17 = vpop.eup %1919 }
 0x16a   : > { %1931 = vpow2.f32 %v1408_v13  ;;  %v1412_v28 = vadd.f32 1.0, %v1920_v17 }
 0x16b   : > { %1933 = vpow2.f32 %v1410_v40  ;;  %v1922_v41 = vpop.eup %1921 }
 0x16c   : > { %v1924_v8 = vpop.eup %1923  ;;  %v1413_v24 = vadd.f32 1.0, %v1922_v41  ;;  %1935 = vlog2.f32 %v1412_v28 }
 0x16d   : > { %v1926_v51 = vpop.eup %1925  ;;  %v1414_v15 = vadd.f32 1.0, %v1924_v8 }
 0x16e   : > { %1937 = vlog2.f32 %v1413_v24  ;;  %v1415_v16 = vadd.f32 1.0, %v1926_v51 }
 0x16f   : > { %1939 = vlog2.f32 %v1414_v15 }
 0x170   : > { %1941 = vlog2.f32 %v1415_v16 }
 0x171   : > { %v1928_v9 = vpop.eup %1927 }
 0x172   : > { %v1416_v38 = vadd.f32 1.0, %v1928_v9 }
 0x173   : > { %v1930_v54 = vpop.eup %1929 }
 0x174   : > { %v1932_v10 = vpop.eup %1931  ;;  %v1417_v33 = vadd.f32 1.0, %v1930_v54  ;;  %1943 = vlog2.f32 %v1416_v38 }
 0x175   : > { %v1934_v32 = vpop.eup %1933  ;;  %v1418_v55 = vadd.f32 1.0, %v1932_v10 }
 0x176   : > { %1945 = vlog2.f32 %v1417_v33  ;;  %v1419_v39 = vadd.f32 1.0, %v1934_v32  ;;  %v1936_v14 = vpop.eup %1935 }
 0x177   : > { %1947 = vlog2.f32 %v1418_v55  ;;  %v1421_v42 = vmul.f32 0.6931472, %v1936_v14 }
 0x178   : > { %1949 = vlog2.f32 %v1419_v39  ;;  %v1938_v47 = vpop.eup %1937 }
 0x179   : > { %v1940_v53 = vpop.eup %1939  ;;  %v1423_v30 = vmul.f32 0.6931472, %v1938_v47  ;;  %v1436_v20 = vsel %vm1380_vm0, %v2663_v37, %v1421_v42 }
 0x17a   : > { %v1942_v0 = vpop.eup %1941  ;;  %v1425_v31 = vmul.f32 0.6931472, %v1940_v53  ;;  %1951 = vtanh.f32 %v1436_v20 }
 0x17b   : > { %v1437_v35 = vsel %vm1381_vm2, %v2665_v12, %v1423_v30  ;;  %v1427_v48 = vmul.f32 0.6931472, %v1942_v0 }
 0x17c   : > { %1953 = vtanh.f32 %v1437_v35  ;;  %v1438_v23 = vsel %vm1382_vm5, %v2667_v7, %v1425_v31 }
 0x17d   : > { %1955 = vtanh.f32 %v1438_v23  ;;  %v1439_v11 = vsel %vm1383_vm6, %v2669_v27, %v1427_v48 }
 0x17e   : > { %v1944_v26 = vpop.eup %1943  ;;  %1957 = vtanh.f32 %v1439_v11 }
 0x17f   : > { %v1429_v57 = vmul.f32 0.6931472, %v1944_v26 }
 0x180   : > { %v1946_v50 = vpop.eup %1945 }
 0x181   : > { %v1948_v18 = vpop.eup %1947  ;;  %v1431_v59 = vmul.f32 0.6931472, %v1946_v50  ;;  %v1440_v3 = vsel %vm1384_vm7, %v2671_v63, %v1429_v57 }
 0x182   : > { %v1950_v43 = vpop.eup %1949  ;;  %v1433_v1 = vmul.f32 0.6931472, %v1948_v18  ;;  %1959 = vtanh.f32 %v1440_v3 }
 0x183   : > { %v1441_v61 = vsel %vm1385_vm8, %v2678_v49, %v1431_v59  ;;  %v1435_v4 = vmul.f32 0.6931472, %v1950_v43 }
 0x184   : > { %1961 = vtanh.f32 %v1441_v61  ;;  %v1442_v6 = vsel %vm1386_vm9, %v2680_v29, %v1433_v1  ;;  %v1952_v19 = vpop.eup %1951 }
 0x185   : > { %1963 = vtanh.f32 %v1442_v6  ;;  %v1443_v60 = vsel %vm1387_vm10, %v2682_v62, %v1435_v4  ;;  %v1452_v36 = vmul.f32 %v1952_v19, %v2663_v37 }
 0x186   : > { %1965 = vtanh.f32 %v1443_v60  ;;  %v1954_v22 = vpop.eup %1953 }
 0x187   : > { %v1956_v34 = vpop.eup %1955  ;;  %v1453_v25 = vmul.f32 %v1954_v22, %v2665_v12  ;;  %1460 = vst [vmem:[%s2172_s26] sm:$0xff] %v1452_v36 }
 0x188   : > { %v1958_v5 = vpop.eup %1957  ;;  %v1454_v21 = vmul.f32 %v1956_v34, %v2667_v7 }
 0x189   : > { %1461 = vst [vmem:[%s2172_s26 + $0x8] sm:$0xff] %v1453_v25  ;;  %v1455_v44 = vmul.f32 %v1958_v5, %v2669_v27 }
 0x18a   : > { %1462 = vst [vmem:[%s2172_s26 + $0x10] sm:$0xff] %v1454_v21 }
 0x18b   : > { %1463 = vst [vmem:[%s2172_s26 + $0x18] sm:$0xff] %v1455_v44 }
 0x18c   : > { %v1960_v2 = vpop.eup %1959 }
 0x18d   : > { %v1456_v52 = vmul.f32 %v1960_v2, %v2671_v63 }
 0x18e   : > { %v1962_v58 = vpop.eup %1961 }
 0x18f   : > { %v1964_v37 = vpop.eup %1963  ;;  %v1457_v46 = vmul.f32 %v1962_v58, %v2678_v49  ;;  %1464 = vst [vmem:[%s2172_s26 + $0x20] sm:$0xff] %v1456_v52 }
 0x190   : > { %v1966_v12 = vpop.eup %1965  ;;  %v1458_v45 = vmul.f32 %v1964_v37, %v2680_v29 }
 0x191   : > { %1465 = vst [vmem:[%s2172_s26 + $0x28] sm:$0xff] %v1457_v46  ;;  %v1459_v7 = vmul.f32 %v1966_v12, %v2682_v62 }
 0x192   : > { %1466 = vst [vmem:[%s2172_s26 + $0x30] sm:$0xff] %v1458_v45 }
 0x193   : > { %1467 = vst [vmem:[%s2172_s26 + $0x38] sm:$0xff] %v1459_v7 }
 0x194 PF: > { %s1674_s15 = sshll.u32 %s2049_s16, 10  ;;  %s1482_s9 = sshll.u32 %s2172_s26, 4  ;;  %s2726_s9 = int_to_ptr.vmem [resolvable:$true] %s1482_s9 }
 0x195   : > { %s2723_s8 = scalar_lea.hbm %s2785_s3, %s1674_s15  ;;  %s2730_s10 = scalar_lea.sflag [#allocation4], %s188_s29 }
 0x196   : > { %s1967_s11 = scalar_lea.vmem %s2726_s9, 1024  ;;  %s2065_s16 = smov [#allocation3]  }
 0x197   : > { %p1968_p2 = scmp.ne.s32.totalorder %s2726_s9, %s1967_s11  ;;  %s1971_s20 = sshll.u32 %s2065_s16, 4  ;;  %s1972_s20 = int_to_ptr.vmem [resolvable:$false] %s1971_s20 }
 0x198   : > { %s1973_s21 = scalar_lea.vmem %s1972_s20, 2048  ;;  %p1974_p6 = scmp.lt.s32.totalorder %s2726_s9, %s1972_s20 }
 0x199   : > { %p1969_p4 = pnand %p1968_p2, %p2137_p3  ;;  %p1975_p7 = scmp.lt.s32.totalorder %s1973_s21, %s1967_s11 }
 0x19b   : > { %p1970_p5 = pneg %p1969_p4  ;;  %p1976_p8 = por %p1975_p7, %p1974_p6 }
 0x19d   : > { %p1977_p10 = pnand %p1976_p8, %p1970_p5 }
 0x19f   : > { %1980 = shalt.err (!%p1977_p10)
}
 0x1a0   : > { %s1981_s29 = scalar_lea.hbm %s2723_s8, 1024  ;;  %s1985_s30 = scalar_lea.hbm %s2785_s3, 2048 }
 0x1a1   : > { %p1982_p11 = scmp.ne.s32.totalorder %s2723_s8, %s1981_s29  ;;  %p1986_p0 = scmp.lt.u32.totalorder %s2723_s8, %s2785_s3 }
 0x1a2   : > { %p1987_p1 = scmp.lt.u32.totalorder %s1985_s30, %s1981_s29  ;;  %p1989_p4 = scmp.lt.u32.totalorder %s1981_s29, %s2723_s8 }
 0x1a3   : > { %p1983_p12 = pnand %p1982_p11, %p2137_p3 }
 0x1a4   : > { %p1988_p2 = por %p1987_p1, %p1986_p0 }
 0x1a5   : > { %p1984_p13 = pneg %p1983_p12 }
 0x1a6   : > { %p1990_p5 = por %p1989_p4, %p1988_p2 }
 0x1a8   : > { %p1991_p6 = pnand %p1990_p5, %p1984_p13 }
 0x1aa   : > { %1994 = shalt.err (!%p1991_p6)
}
 0x1ab   : > { %s2066_s15 = smov 128   ;;  %s2067_s6 = smov 8  }
 0x1ac   : > { %1840 = dma.vmem_to_hbm [thread:$0]  (%p2137_p3), %s2726_s9, 1024, %s2723_s8, %s2730_s10, %s2066_s15, %s2066_s15, %s2067_s6  }
 0x1ad PF: > { %p1846_p7 = scmp.ge.s32.totalorder %s2061_s19, 2  ;;  %s1497_s7 = sand.u32 1, %s2033_s12  }
 0x1ae   : > { %s1498_s11 = scalar_lea.sflag [#allocation4], %s1497_s7 }
 0x1af   : > { %p1843_p8 = pnand %p1846_p7, %p2147_p9 }
 0x1b1   : > { %2028 = dma.done.wait (!%p1843_p8), %s1498_s11, 1024  }
 0x1b2   : > { %2030 = vsyncadd (!%p1843_p8), %s1498_s11, 4294966272  ;;  %s16_s19 = sadd.s32 1, %s2061_s19   ;;  %s2826_s12 = smov %s2037_s13 }
 0x1b3   : > { %p13_p10 = scmp.ge.s32.totalorder %s16_s19, 16   ;;  %s2827_s13 = smov %s2041_s14 }
 0x1b4   : > { %s2828_s14 = smov %s2155_s28  ;;  %s2829_s15 = smov %s2053_s17 }
 0x1b5   : > { %s2830_s16 = smov %s2057_s18  ;;  %s2831_s17 = smov %s2834_s22 }
 0x1b6   : > { %s2832_s18 = smov %s2838_s23  ;;  %15 = sbr.rel (!%p13_p10) target bundleno = 5 (0x5), region = 85 }
 0x1bd   :  { %1503 = vsyncpa [#allocation4], 1 }
 0x1be   :  { %1505 = vsyncpa [#allocation4 + $0x1], 1 }

</bundles_post_ra>
